<compile_context>
chip_gen: v6e
topology: v6e:2x2x1
jax: 0.10.0
libtpu: 0.0.40
codegen_flags: <defaults>
</compile_context>

<pallas_src>
import jax
import jax.numpy as jnp
from jax.experimental import pallas as pl
from jax.experimental.pallas import tpu as pltpu


def attention_kernel(hid_ref, enc_ref, mask_ref,
                     wa_h_ref, wa_e_ref, ba_ref, v_ref, out_ref):
    # hid_ref : [TB, Dd]       bf16
    # enc_ref : [S, TB, 2De]   bf16   (s-major, native PyTorch layout)
    # mask_ref: [S, TB]        int32  (0 = padded position)
    # out_ref : [S, TB]        f32    (softmax over S == axis 0)

    # hidden projection: once per batch tile (independent of S).   [TB, Dd] f32
    h_proj = jnp.dot(hid_ref[...], wa_h_ref[...],
                     preferred_element_type=jnp.float32) + ba_ref[...]

    # encoder projection on the MXU, f32 accumulation.              [S, TB, Dd]
    e_proj = jax.lax.dot_general(
        enc_ref[...], wa_e_ref[...],
        dimension_numbers=(((2,), (0,)), ((), ())),
        preferred_element_type=jnp.float32)

    # energy = tanh(attn(cat(hidden, enc)))   (tanh kept in f32)
    energy = jnp.tanh(e_proj + h_proj[None, :, :])                 # [S, TB, Dd]

    # attention = v(energy).squeeze(-1)   (v has no bias)
    scores = jnp.sum(energy * v_ref[...][None, :, :], axis=-1)     # [S, TB]

    # masked_fill(mask == 0, -1e10) in f32
    scores = jnp.where(mask_ref[...] == 0,
                       jnp.float32(-10000000000.0), scores)

    # softmax over src_len (axis 0 in this orientation)
    m = jnp.max(scores, axis=0, keepdims=True)                     # [1, TB]
    e = jnp.exp(scores - m)
    denom = jnp.sum(e, axis=0, keepdims=True)                      # [1, TB]
    out_ref[...] = e * pl.reciprocal(denom, approx=True)


def _pick_batch_tile(B, S, E2, bytes_per_elem=2,
                     tile_budget_bytes=4 * 1024 * 1024):
    """Largest batch tile whose enc block fits the per-buffer VMEM budget.

    Returned tile is either the full batch dim or a multiple of 8 (sublane rule),
    sized so a double-buffered bf16 enc block stays well under v7x's VMEM."""
    per_batch = max(1, S * E2 * bytes_per_elem)
    tb = tile_budget_bytes // per_batch
    if tb >= B:
        return B
    return max(8, (tb // 8) * 8)


@jax.jit
def attention_forward(hidden, encoder_outputs, mask, w_attn, b_attn, w_v):
    """hidden [B, Dd]; encoder_outputs [S, B, 2*De] (PyTorch layout); mask [B, S].

    Returns attention weights [B, S] (softmax over src_len), matching
    Attention.forward."""
    S, B, E2 = encoder_outputs.shape
    Dd = hidden.shape[1]

    # PyTorch Linear: y = x @ W.T + b with W: [out, in]; input features are
    # cat(hidden, enc) -> split W into the hidden half and the enc half.
    wa_h = jnp.transpose(w_attn[:, :Dd]).astype(jnp.bfloat16)      # [Dd, Dd]
    wa_e = jnp.transpose(w_attn[:, Dd:]).astype(jnp.bfloat16)      # [E2, Dd]
    ba = b_attn.reshape(1, Dd).astype(jnp.float32)                 # [1, Dd]
    v = w_v.reshape(1, Dd).astype(jnp.float32)                     # [1, Dd]

    enc = encoder_outputs.astype(jnp.bfloat16)                     # [S, B, E2]
    hid = hidden.astype(jnp.bfloat16)                              # [B, Dd]
    mask_sb = jnp.transpose(mask).astype(jnp.int32)                # [S, B] (tiny)

    TB = _pick_batch_tile(B, S, E2)
    grid = (pl.cdiv(B, TB),)

    out_sb = pl.pallas_call(
        attention_kernel,
        out_shape=jax.ShapeDtypeStruct((S, B), jnp.float32),
        grid=grid,
        in_specs=[
            pl.BlockSpec((TB, Dd), lambda b: (b, 0)),        # hidden
            pl.BlockSpec((S, TB, E2), lambda b: (0, b, 0)),  # encoder_outputs
            pl.BlockSpec((S, TB), lambda b: (0, b)),         # mask (s-major)
            pl.BlockSpec((Dd, Dd), lambda b: (0, 0)),        # W_attn, hidden half
            pl.BlockSpec((E2, Dd), lambda b: (0, 0)),        # W_attn, enc half
            pl.BlockSpec((1, Dd), lambda b: (0, 0)),         # b_attn
            pl.BlockSpec((1, Dd), lambda b: (0, 0)),         # v weight
        ],
        out_specs=pl.BlockSpec((S, TB), lambda b: (0, b)),
        compiler_params=pltpu.CompilerParams(
            dimension_semantics=("parallel",),
            vmem_limit_bytes=32 * 1024 * 1024),
    )(hid, enc, mask_sb, wa_h, wa_e, ba, v)

    # Only the tiny [S, B] attention-weight tensor is transposed (not the big enc).
    return jnp.transpose(out_sb)                                   # [B, S]


def _reference(hidden, encoder_outputs, mask, w_attn, b_attn, w_v):
    S, B, _ = encoder_outputs.shape
    h = jnp.repeat(hidden[:, None, :], S, axis=1)                  # [B, S, Dd]
    enc = jnp.transpose(encoder_outputs, (1, 0, 2))                # [B, S, 2De]
    x = jnp.concatenate([h, enc], axis=2)
    energy = jnp.tanh(x @ w_attn.T + b_attn)                       # [B, S, Dd]
    att = jnp.squeeze(energy @ w_v.T, axis=2)                      # [B, S]
    att = jnp.where(mask == 0, -10000000000.0, att)
    return jax.nn.softmax(att, axis=1)


if __name__ == "__main__":
    # small shapes consistent with the module
    B, S = 2, 8
    enc_hid_dim, dec_hid_dim = 16, 32
    E2 = enc_hid_dim * 2

    key = jax.random.PRNGKey(0)
    k1, k2, k3, k4, k5 = jax.random.split(key, 5)

    hidden = jax.random.normal(k1, (B, dec_hid_dim), dtype=jnp.float32)
    encoder_outputs = jax.random.normal(k2, (S, B, E2), dtype=jnp.float32)
    # mask: first row fully valid, second row has last 3 positions padded
    mask = jnp.ones((B, S), dtype=jnp.int32).at[1, 5:].set(0)

    # deterministic parameter init (shapes follow nn.Linear in __init__)
    w_attn = 0.1 * jax.random.normal(k3, (dec_hid_dim, E2 + dec_hid_dim),
                                     dtype=jnp.float32)   # attn.weight [out, in]
    b_attn = 0.1 * jax.random.normal(k4, (dec_hid_dim,), dtype=jnp.float32)
    w_v = 0.1 * jax.random.normal(k5, (1, dec_hid_dim), dtype=jnp.float32)  # v.weight

    out = attention_forward(hidden, encoder_outputs, mask, w_attn, b_attn, w_v)
    out = jax.block_until_ready(out)

    ref = _reference(hidden, encoder_outputs, mask, w_attn, b_attn, w_v)
    assert out.shape == (B, S)
    # bf16 matmul inputs + approx reciprocal -> compare with a loose tolerance
    assert jnp.allclose(out, ref, atol=1e-2, rtol=1e-2), (out, ref)
    assert jnp.allclose(jnp.sum(out, axis=1), 1.0, atol=1e-2)

    print("KERNEL_OK")
</pallas_src>

<mosaic_0001>
module attributes {stable_mosaic.version = 11 : i64} {
  func.func @attention_kernel(%arg0: i32, %arg1: memref<2x32xbf16, #tpu.memory_space<vmem>>, %arg2: memref<8x2x32xbf16, #tpu.memory_space<vmem>>, %arg3: memref<8x2xi32, #tpu.memory_space<vmem>>, %arg4: memref<32x32xbf16, #tpu.memory_space<vmem>>, %arg5: memref<32x32xbf16, #tpu.memory_space<vmem>>, %arg6: memref<1x32xf32, #tpu.memory_space<vmem>>, %arg7: memref<1x32xf32, #tpu.memory_space<vmem>>, %arg8: memref<8x2xf32, #tpu.memory_space<vmem>>) attributes {dimension_semantics = [#tpu.dimension_semantics<parallel>], iteration_bounds = array<i64: 1>, scalar_prefetch = 0 : i64, scratch_operands = 0 : i64, tpu.core_type = #tpu.core_type<tc>, window_params = [{transform_indices = @transform_0, window_bounds = array<i64: 2, 32>}, {transform_indices = @transform_1, window_bounds = array<i64: 8, 2, 32>}, {transform_indices = @transform_2, window_bounds = array<i64: 8, 2>}, {pipeline_mode = #tpu.pipeline_mode<synchronous>, transform_indices = @transform_3, window_bounds = array<i64: 32, 32>}, {pipeline_mode = #tpu.pipeline_mode<synchronous>, transform_indices = @transform_4, window_bounds = array<i64: 32, 32>}, {pipeline_mode = #tpu.pipeline_mode<synchronous>, transform_indices = @transform_5, window_bounds = array<i64: 1, 32>}, {pipeline_mode = #tpu.pipeline_mode<synchronous>, transform_indices = @transform_6, window_bounds = array<i64: 1, 32>}, {transform_indices = @transform_7, window_bounds = array<i64: 8, 2>}]} {
    %c0 = arith.constant 0 : index
    %c0_0 = arith.constant 0 : index
    %0 = vector.load %arg1[%c0, %c0_0] : memref<2x32xbf16, #tpu.memory_space<vmem>>, vector<2x32xbf16>
    %c0_1 = arith.constant 0 : index
    %c0_2 = arith.constant 0 : index
    %1 = vector.load %arg4[%c0_1, %c0_2] : memref<32x32xbf16, #tpu.memory_space<vmem>>, vector<32x32xbf16>
    %cst = arith.constant dense<0.000000e+00> : vector<2x32xf32>
    %2 = tpu.matmul %0, %1, %cst {dimension_numbers = #tpu.dot_dimension_numbers<[1], [0], [0], [1], [0, 0, 1, 1], [], []>} : vector<2x32xbf16>, vector<32x32xbf16>, vector<2x32xf32> -> vector<2x32xf32>
    %c0_3 = arith.constant 0 : index
    %c0_4 = arith.constant 0 : index
    %3 = vector.load %arg6[%c0_3, %c0_4] : memref<1x32xf32, #tpu.memory_space<vmem>>, vector<1x32xf32>
    %4 = vector.broadcast %3 : vector<1x32xf32> to vector<2x32xf32>
    %5 = arith.addf %2, %4 : vector<2x32xf32>
    %c0_5 = arith.constant 0 : index
    %c0_6 = arith.constant 0 : index
    %c0_7 = arith.constant 0 : index
    %6 = vector.load %arg2[%c0_5, %c0_6, %c0_7] : memref<8x2x32xbf16, #tpu.memory_space<vmem>>, vector<8x2x32xbf16>
    %c0_8 = arith.constant 0 : index
    %c0_9 = arith.constant 0 : index
    %7 = vector.load %arg5[%c0_8, %c0_9] : memref<32x32xbf16, #tpu.memory_space<vmem>>, vector<32x32xbf16>
    %cst_10 = arith.constant dense<0.000000e+00> : vector<8x2x32xf32>
    %8 = tpu.matmul %6, %7, %cst_10 {dimension_numbers = #tpu.dot_dimension_numbers<[2], [0], [0, 1], [1], [0, 0, 0, 1, 1, 1], [], []>} : vector<8x2x32xbf16>, vector<32x32xbf16>, vector<8x2x32xf32> -> vector<8x2x32xf32>
    %9 = vector.shape_cast %5 : vector<2x32xf32> to vector<1x2x32xf32>
    %10 = vector.broadcast %9 : vector<1x2x32xf32> to vector<8x2x32xf32>
    %11 = arith.addf %8, %10 : vector<8x2x32xf32>
    %12 = math.tanh %11 : vector<8x2x32xf32>
    %c0_11 = arith.constant 0 : index
    %c0_12 = arith.constant 0 : index
    %13 = vector.load %arg7[%c0_11, %c0_12] : memref<1x32xf32, #tpu.memory_space<vmem>>, vector<1x32xf32>
    %14 = vector.shape_cast %13 : vector<1x32xf32> to vector<1x1x32xf32>
    %15 = vector.broadcast %14 : vector<1x1x32xf32> to vector<8x2x32xf32>
    %16 = arith.mulf %12, %15 : vector<8x2x32xf32>
    %cst_13 = arith.constant dense<0.000000e+00> : vector<8x2xf32>
    %17 = vector.multi_reduction <add>, %16, %cst_13 [2] : vector<8x2x32xf32> to vector<8x2xf32>
    %c0_14 = arith.constant 0 : index
    %c0_15 = arith.constant 0 : index
    %18 = vector.load %arg3[%c0_14, %c0_15] : memref<8x2xi32, #tpu.memory_space<vmem>>, vector<8x2xi32>
    %c0_i32 = arith.constant 0 : i32
    %19 = vector.broadcast %c0_i32 : i32 to vector<8x2xi32>
    %20 = arith.cmpi eq, %18, %19 : vector<8x2xi32>
    %cst_16 = arith.constant -1.000000e+10 : f32
    %21 = vector.broadcast %cst_16 : f32 to vector<8x2xf32>
    %22 = arith.select %20, %21, %17 : vector<8x2xi1>, vector<8x2xf32>
    %cst_17 = arith.constant dense<0xFF800000> : vector<2xf32>
    %23 = vector.multi_reduction <maximumf>, %22, %cst_17 [0] : vector<8x2xf32> to vector<2xf32>
    %24 = vector.shape_cast %23 : vector<2xf32> to vector<1x2xf32>
    %25 = vector.broadcast %24 : vector<1x2xf32> to vector<8x2xf32>
    %26 = arith.subf %22, %25 : vector<8x2xf32>
    %27 = math.exp %26 : vector<8x2xf32>
    %cst_18 = arith.constant dense<0.000000e+00> : vector<2xf32>
    %28 = vector.multi_reduction <add>, %27, %cst_18 [0] : vector<8x2xf32> to vector<2xf32>
    %29 = vector.shape_cast %28 : vector<2xf32> to vector<1x2xf32>
    %30 = tpu.reciprocal %29 {approx = true} : vector<1x2xf32> -> vector<1x2xf32>
    %31 = vector.broadcast %30 : vector<1x2xf32> to vector<8x2xf32>
    %32 = arith.mulf %27, %31 : vector<8x2xf32>
    %c0_19 = arith.constant 0 : index
    %c0_20 = arith.constant 0 : index
    %33 = vector.load %arg8[%c0_19, %c0_20] : memref<8x2xf32, #tpu.memory_space<vmem>>, vector<8x2xf32>
    tpu.vector_store %arg8[%c0_19, %c0_20], %32 {strides = array<i32>} : memref<8x2xf32, #tpu.memory_space<vmem>>, vector<8x2xf32>,
    return
  }
  func.func @transform_0(%arg0: i32) -> (i32, i32) {
    %c0_i32 = arith.constant 0 : i32
    %c0_i32_0 = arith.constant 0 : i32
    return %arg0, %c0_i32 : i32, i32
  }
  func.func @transform_1(%arg0: i32) -> (i32, i32, i32) {
    %c0_i32 = arith.constant 0 : i32
    %c0_i32_0 = arith.constant 0 : i32
    %c0_i32_1 = arith.constant 0 : i32
    return %c0_i32, %arg0, %c0_i32_0 : i32, i32, i32
  }
  func.func @transform_2(%arg0: i32) -> (i32, i32) {
    %c0_i32 = arith.constant 0 : i32
    %c0_i32_0 = arith.constant 0 : i32
    return %c0_i32, %arg0 : i32, i32
  }
  func.func @transform_3(%arg0: i32) -> (i32, i32) {
    %c0_i32 = arith.constant 0 : i32
    %c0_i32_0 = arith.constant 0 : i32
    %c0_i32_1 = arith.constant 0 : i32
    return %c0_i32, %c0_i32_0 : i32, i32
  }
  func.func @transform_4(%arg0: i32) -> (i32, i32) {
    %c0_i32 = arith.constant 0 : i32
    %c0_i32_0 = arith.constant 0 : i32
    %c0_i32_1 = arith.constant 0 : i32
    return %c0_i32, %c0_i32_0 : i32, i32
  }
  func.func @transform_5(%arg0: i32) -> (i32, i32) {
    %c0_i32 = arith.constant 0 : i32
    %c0_i32_0 = arith.constant 0 : i32
    %c0_i32_1 = arith.constant 0 : i32
    return %c0_i32, %c0_i32_0 : i32, i32
  }
  func.func @transform_6(%arg0: i32) -> (i32, i32) {
    %c0_i32 = arith.constant 0 : i32
    %c0_i32_0 = arith.constant 0 : i32
    %c0_i32_1 = arith.constant 0 : i32
    return %c0_i32, %c0_i32_0 : i32, i32
  }
  func.func @transform_7(%arg0: i32) -> (i32, i32) {
    %c0_i32 = arith.constant 0 : i32
    %c0_i32_0 = arith.constant 0 : i32
    return %c0_i32, %arg0 : i32, i32
  }
}

</mosaic_0001>

<bundles_post_ra>
// kernel: attention_forward.1
= control target key start
LH: loop header
LB: loop body
LE: loop exit
PB: predicated region body
PF: predicated region fallthrough
CT: control target
= control target key end

     0   :  { %v466_v0 = vmov 0.0   ;;  %v467_v2 = vmov 1966171168   ;;  %v122_v4 = vlaneseq  ;;  %vm468_vm0 = vmmov 0   ;;  %s581_s3 = inlined_call_operand.vmem [shape: bf16[32,32], index: 3, kind: input, shape index: {}]   ;;  %s582_s4 = inlined_call_operand.vmem [shape: bf16[32,32], index: 4, kind: input, shape index: {}]   ;;  %s583_s0 = inlined_call_operand.vmem [shape: bf16[2,32], index: 0, kind: input, shape index: {}]   ;;  %s584_s1 = inlined_call_operand.vmem [shape: bf16[8,2,32], index: 1, kind: input, shape index: {}]   ;;  %s585_s5 = inlined_call_operand.vmem [shape: f32[1,32], index: 5, kind: input, shape index: {}]   ;;  %s586_s6 = inlined_call_operand.vmem [shape: f32[1,32], index: 6, kind: input, shape index: {}]   ;;  %s587_s2 = inlined_call_operand.vmem [shape: s32[8,2], index: 2, kind: input, shape index: {}]   ;;  %s588_s7 = inlined_call_operand.vmem [shape: f32[8,2], index: 7, kind: output, shape index: {}]  }
   0x1   :  { %422 = vmatprep.subr.bf16.mxu0 %v466_v0  ;;  %v442_v1 = vld [vmem:[%s581_s3 + $0x8] sm:$0xff]   ;;  %430 = vmatprep.subr.bf16.mxu1 %v466_v0  ;;  %v120_v3 = vunpack.c.l.s4 %v467_v2  ;;  %v443_v5 = vld [vmem:[%s581_s3] sm:$0xff]   ;;  %vm51_vm1 = vcmask 261120   ;;  %v469_v33 = vmov 1983009808   ;;  %vm298_vm2 = vcmask 254976  }
   0x2   :  { %426 = vmatprep.mubr.msk.bf16.mxu0 %vm468_vm0, %v466_v0  ;;  %434 = vmatprep.mubr.msk.bf16.mxu1 %vm468_vm0, %v466_v0  ;;  %v444_v6 = vld [vmem:[%s582_s4 + $0x8] sm:$0xff]   ;;  %v520_v8 = vshrl.u32 %v122_v4, 7  ;;  %v27_v9 = vld [vmem:[%s583_s0] sm:$0x1]  ;;  %v96_v12 = vld [vmem:[%s584_s1 + $0x1] sm:$0x1]  ;;  %v179_v34 = vunpack.c.l.s4 %v469_v33 }
   0x3   :  { %423 = vmatpush3.bf16.msra.mxu0 %v442_v1  ;;  %v121_v7 = vunpack.c.0.s8 %v120_v3  ;;  %431 = vmatpush3.bf16.msra.mxu1 %v444_v6  ;;  %v445_v10 = vld [vmem:[%s582_s4] sm:$0xff]   ;;  %vm367_vm3 = vcmask 1041409   ;;  %vm369_vm4 = vcmask 1042434   ;;  %vm371_vm5 = vcmask 1043459  }
   0x4   :  { %424 = vmatprep.subr.bf16.mxu0 %v466_v0  ;;  %v95_v11 = vld [vmem:[%s584_s1] sm:$0x1]  ;;  %432 = vmatprep.subr.bf16.mxu1 %v466_v0  ;;  %v97_v14 = vld [vmem:[%s584_s1 + $0x2] sm:$0x1]  ;;  %v98_v15 = vld [vmem:[%s584_s1 + $0x3] sm:$0x1]  ;;  %v180_v35 = vunpack.c.0.s8 %v179_v34 }
   0x5   :  { %v124_v13 = vsub.s32 %v121_v7, %v520_v8  ;;  %v99_v16 = vld [vmem:[%s584_s1 + $0x4] sm:$0x1]  ;;  %v115_v17 = vcombine.low %v95_v11, %v96_v12  ;;  %v100_v18 = vld [vmem:[%s584_s1 + $0x5] sm:$0x1]  ;;  %v101_v19 = vld [vmem:[%s584_s1 + $0x6] sm:$0x1]  ;;  %v116_v21 = vcombine.low %v97_v14, %v98_v15 }
   0x6   :  { %v102_v20 = vld [vmem:[%s584_s1 + $0x7] sm:$0x1]  ;;  %v117_v22 = vcombine.low %v99_v16, %v100_v18  ;;  %v408_v36 = vld [vmem:[%s585_s5] ss:$0 sm:$0xff]  ;;  %v183_v39 = vsub.s32 %v180_v35, %v520_v8  ;;  %vm373_vm6 = vcmask 1044484   ;;  %vm375_vm7 = vcmask 1045509  }
   0x7   :  { %425 = vmatpush3.bf16.msra.mxu0 %v443_v5  ;;  %v118_v23 = vcombine.low %v101_v19, %v102_v20  ;;  %v125_v24 = vrot.slane %v115_v17, %v124_v13  ;;  %433 = vmatpush3.bf16.msra.mxu1 %v445_v10  ;;  %v132_v25 = vrot.slane %v116_v21, %v124_v13  ;;  %v415_v62 = vld [vmem:[%s586_s6] ss:$0 sm:$0xff]  ;;  %vm377_vm8 = vcmask 1046534  }
   0x8   :  { %v139_v26 = vrot.slane %v117_v22, %v124_v13  ;;  %vm379_vm9 = vcmask 1047559   ;;  %vm383_vm11 = vcmask 15360  }
   0x9   :  { %v146_v27 = vrot.slane %v118_v23, %v124_v13  ;;  %v147_v28 = vcombine.low %v125_v24, %v132_v25  ;;  %v334_v25 = vand.u32 127, %v122_v4 }
   0xa   :  { %427 = vmatmul.mubr.msk.bf16.vlgmr.msra.gmra.mxu0 %vm51_vm1, %v27_v9 }
   0xb   :  { %v148_v29 = vcombine.low %v139_v26, %v146_v27  ;;  %v155_v30 = vrot.slane %v147_v28, %v124_v13  ;;  %v337_v28 = vsub.s32 %v334_v25, %v520_v8  ;;  %v323_v8 = vld [vmem:[%s587_s2] sm:$0xff] }
   0xc   :  { %vm324_vm10 = vcmp.eq.s32.totalorder %v323_v8, 0 }
   0xd   :  { %v162_v31 = vrot.slane %v148_v29, %v124_v13 }
   0xf   :  { %v163_v32 = vcombine.low %v155_v30, %v162_v31 }
  0x11   :  { %435 = vmatmul.mubr.msk.bf16.vlgmr.msra.gmra.mxu1 %vm51_vm1, %v163_v32 }
  0xca   :  { %v89_v37 = vpop.f32.mrf.mxu0 }
  0xcb   :  { %v90_v38 = vadd.f32 %v408_v36, %v89_v37 }
  0xcc   :  { %v428_v40 = vpop.f32.mrf.mxu0 }
  0xcd   :  { %v177_v41 = vcombine.low %v90_v38, %v90_v38 }
  0xce   :  { %v92_v42 = vpop.f32.mrf.mxu0 }
  0xcf   :  { %v184_v43 = vrot.slane %v177_v41, %v183_v39 }
  0xd0   :  { %v429_v44 = vpop.f32.mrf.mxu0 }
  0xd1   :  { %v185_v45 = vcombine.low %v184_v43, %v184_v43  ;;  %v224_v46 = vpop.f32.mrf.mxu1 }
  0xd3   :  { %v225_v47 = vadd.f32 %v224_v46, %v185_v45  ;;  %v436_v48 = vpop.f32.mrf.mxu1 }
  0xd5   :  { %v233_v49 = vcombine.high %v225_v47, %v225_v47  ;;  %v240_v50 = vrot.slane %v225_v47, %v183_v39  ;;  %v227_v51 = vpop.f32.mrf.mxu1 }
  0xd6   :  { %v228_v54 = vadd.f32 %v227_v51, %v185_v45 }
  0xd7   :  { %v247_v52 = vrot.slane %v233_v49, %v183_v39  ;;  %v248_v53 = vcombine.high %v240_v50, %v240_v50  ;;  %446 = vtanh.f32 %v240_v50  ;;  %v437_v55 = vpop.f32.mrf.mxu1 }
  0xd8   :  { %v250_v56 = vcombine.high %v228_v54, %v228_v54  ;;  %v257_v57 = vrot.slane %v228_v54, %v183_v39 }
  0xd9   :  { %448 = vtanh.f32 %v248_v53  ;;  %v249_v58 = vcombine.high %v247_v52, %v247_v52 }
  0xda   :  { %450 = vtanh.f32 %v247_v52  ;;  %v264_v59 = vrot.slane %v250_v56, %v183_v39  ;;  %v265_v60 = vcombine.high %v257_v57, %v257_v57 }
  0xdb   :  { %452 = vtanh.f32 %v257_v57 }
  0xdc   :  { %454 = vtanh.f32 %v265_v60  ;;  %v266_v61 = vcombine.high %v264_v59, %v264_v59 }
  0xdd   :  { %456 = vtanh.f32 %v249_v58 }
  0xde   :  { %458 = vtanh.f32 %v264_v59 }
  0xdf   :  { %460 = vtanh.f32 %v266_v61 }
  0xe4   :  { %v447_v63 = vpop.eup %446 }
  0xe5   :  { %v290_v0 = vmul.f32 %v447_v63, %v415_v62 }
  0xe6   :  { %v449_v1 = vpop.eup %448 }
  0xe7   :  { %v451_v2 = vpop.eup %450  ;;  %v299_v3 = vsel %vm298_vm2, %v290_v0, 0.0  ;;  %v291_v5 = vmul.f32 %v449_v1, %v415_v62 }
  0xe8   :  { %300 = vadd.xlane.f32.xlu0 %v299_v3  ;;  %v292_v6 = vmul.f32 %v451_v2, %v415_v62  ;;  %v453_v7 = vpop.eup %452 }
  0xe9   :  { %v455_v9 = vpop.eup %454  ;;  %v302_v12 = vsel %vm298_vm2, %v291_v5, 0.0  ;;  %v294_v14 = vmul.f32 %v453_v7, %v415_v62 }
  0xea   :  { %v305_v10 = vsel %vm298_vm2, %v292_v6, 0.0  ;;  %v457_v11 = vpop.eup %456  ;;  %v295_v13 = vmul.f32 %v455_v9, %v415_v62 }
  0xeb   :  { %306 = vadd.xlane.f32.xlu1 %v305_v10  ;;  %v459_v15 = vpop.eup %458  ;;  %v293_v17 = vmul.f32 %v457_v11, %v415_v62  ;;  %v311_v19 = vsel %vm298_vm2, %v294_v14, 0.0 }
  0xec   :  { %303 = vadd.xlane.f32.xlu0 %v302_v12  ;;  %v314_v16 = vsel %vm298_vm2, %v295_v13, 0.0  ;;  %v461_v18 = vpop.eup %460  ;;  %v296_v20 = vmul.f32 %v459_v15, %v415_v62 }
  0xed   :  { %v308_v21 = vsel %vm298_vm2, %v293_v17, 0.0  ;;  %v297_v22 = vmul.f32 %v461_v18, %v415_v62 }
  0xee   :  { %v317_v23 = vsel %vm298_vm2, %v296_v20, 0.0 }
  0xef   :  { %315 = vadd.xlane.f32.xlu1 %v314_v16  ;;  %v320_v24 = vsel %vm298_vm2, %v297_v22, 0.0 }
  0xf0   :  { %312 = vadd.xlane.f32.xlu0 %v311_v19 }
  0xf3   :  { %309 = vadd.xlane.f32.xlu1 %v308_v21 }
  0xf4   :  { %318 = vadd.xlane.f32.xlu0 %v317_v23 }
  0xf7   :  { %321 = vadd.xlane.f32.xlu1 %v320_v24 }
 0x171   :  { %v301_v26 = vpop.xlane.xlu0 %300 }
 0x172   :  { %v338_v32 = vrot.slane %v301_v26, %v337_v28 }
 0x174   :  { %v307_v27 = vpop.xlane.xlu1 %306 }
 0x175   :  { %v304_v29 = vpop.xlane.xlu0 %303  ;;  %v346_v35 = vrot.slane %v307_v27, %v337_v28 }
 0x176   :  { %v342_v30 = vrot.slane %v304_v29, %v337_v28 }
 0x178   :  { %v316_v31 = vpop.xlane.xlu1 %315  ;;  %v368_v34 = vsel %vm367_vm3, %v342_v30, %v338_v32 }
 0x179   :  { %v313_v33 = vpop.xlane.xlu0 %312  ;;  %v370_v4 = vsel %vm369_vm4, %v346_v35, %v368_v34  ;;  %v358_v41 = vrot.slane %v316_v31, %v337_v28 }
 0x17a   :  { %v354_v39 = vrot.slane %v313_v33, %v337_v28 }
 0x17c   :  { %v310_v36 = vpop.xlane.xlu1 %309 }
 0x17d   :  { %v350_v37 = vrot.slane %v310_v36, %v337_v28  ;;  %v319_v38 = vpop.xlane.xlu0 %318 }
 0x17e   :  { %v362_v40 = vrot.slane %v319_v38, %v337_v28 }
 0x17f   :  { %v372_v42 = vsel %vm371_vm5, %v350_v37, %v370_v4 }
 0x180   :  { %v374_v43 = vsel %vm373_vm6, %v354_v39, %v372_v42  ;;  %v322_v44 = vpop.xlane.xlu1 %321 }
 0x181   :  { %v376_v45 = vsel %vm375_vm7, %v358_v41, %v374_v43  ;;  %v366_v46 = vrot.slane %v322_v44, %v337_v28 }
 0x182   :  { %v378_v47 = vsel %vm377_vm8, %v362_v40, %v376_v45 }
 0x183   :  { %v380_v48 = vsel %vm379_vm9, %v366_v46, %v378_v47 }
 0x184   :  { %v382_v49 = vsel %vm324_vm10, -1e+10, %v380_v48 }
 0x185   :  { %v384_v50 = vsel %vm383_vm11, %v382_v49, -inf }
 0x186   :  { %v385_v51 = vrot.slane %v384_v50, 4 }
 0x188   :  { %v386_v52 = vmax.f32 %v384_v50, %v385_v51 }
 0x18a   :  { %v387_v53 = vrot.slane %v386_v52, 2 }
 0x18c   :  { %v388_v54 = vmax.f32 %v386_v52, %v387_v53 }
 0x18e   :  { %v389_v55 = vrot.slane %v388_v54, 1 }
 0x190   :  { %v390_v56 = vmax.f32 %v388_v54, %v389_v55 }
 0x192   :  { %v391_v57 = vsub.f32 %v382_v49, %v390_v56 }
 0x194   :  { %v392_v58 = vmul.f32 1.442695, %v391_v57 }
 0x196   :  { %462 = vpow2.f32 %v392_v58 }
 0x1a3   :  { %v463_v59 = vpop.eup %462 }
 0x1a4   :  { %v394_v60 = vsel %vm383_vm11, %v463_v59, 0.0 }
 0x1a5   :  { %v395_v61 = vrot.slane %v394_v60, 4 }
 0x1a7   :  { %v396_v62 = vadd.f32 %v395_v61, %v394_v60 }
 0x1a9   :  { %v397_v63 = vrot.slane %v396_v62, 2 }
 0x1ab   :  { %v398_v0 = vadd.f32 %v397_v63, %v396_v62 }
 0x1ad   :  { %v399_v1 = vrot.slane %v398_v0, 1 }
 0x1af   :  { %v400_v2 = vadd.f32 %v399_v1, %v398_v0 }
 0x1b1   :  { %464 = vrcp.f32 %v400_v2 }
 0x1be   :  { %v465_v3 = vpop.eup %464 }
 0x1bf   :  { %v402_v5 = vmul.f32 %v465_v3, %v463_v59 }
 0x1c1   :  { %403 = vst.msk [vmem:[%s588_s7] sm:$0xff] %vm383_vm11, %v402_v5 }

</bundles_post_ra>
